<compile_context>
chip_gen: v7x
topology: tpu7x:2x2x1
jax: 0.10.0
libtpu: 0.0.40
codegen_flags: <defaults>
</compile_context>

<pallas_src>
import functools

import jax
import jax.numpy as jnp
from jax import lax
from jax.experimental import pallas as pl
from jax.experimental.pallas import tpu as pltpu


def rnn_fused_kernel(xs_ref, wx_ref, wh_ref, b_ref, h0_ref, out_ref, xw_scr,
                     *, seq_len, bpad, hidden_size, output_size):
    """Single-invocation kernel: hoisted x-projection GEMM + in-kernel recurrence.

    xs_ref : (T*BPAD, I)     all timesteps, batch-padded, flattened
    wx_ref : (I, NPAD)       input  -> (hidden | output) fused weight
    wh_ref : (H, NPAD)       hidden -> (hidden | output) fused weight (shrunk)
    b_ref  : (1, NPAD)       fused bias (pad lanes zero)
    h0_ref : (BPAD, NPAD)    initial hidden slab (hidden in lanes [0, H))
    out_ref: (T*BPAD, NPAD)  per-step output slab (lane-dense stores)
    xw_scr : (T*BPAD, NPAD)  VMEM scratch holding the hoisted x-projection
    """
    npad = out_ref.shape[-1]

    # ---- Phase 1: hoisted input projection + bias, one big GEMM (M = T*BPAD).
    xw_scr[...] = jnp.dot(
        xs_ref[...], wx_ref[...],
        precision=lax.Precision.HIGHEST,
        preferred_element_type=jnp.float32) + b_ref[...]

    # ---- Loop invariants, hoisted (no broadcast_in_dim re-materialization).
    lane = lax.broadcasted_iota(jnp.int32, (bpad, npad), 1)
    is_logit = (lane >= hidden_size) & (lane < hidden_size + output_size)
    neg_big = jnp.full((bpad, npad), -1e30, dtype=jnp.float32)
    wh = wh_ref[...]                                     # (H, NPAD), resident

    # ---- Phase 2: sequential recurrence; carry = raw pre-softmax fused slab.
    def step(t, h_slab):
        row = pl.multiple_of(t * bpad, bpad)
        fused = xw_scr[pl.ds(row, bpad), :] + jnp.dot(
            h_slab[:, :hidden_size], wh,
            precision=lax.Precision.HIGHEST,
            preferred_element_type=jnp.float32)          # (BPAD, NPAD)

        # Log-softmax epilogue: off the loop-carried chain (carry is `fused`).
        logits = jnp.where(is_logit, fused, neg_big)
        m = jnp.max(logits, axis=1, keepdims=True)
        shifted = logits - m
        lse = jnp.log(jnp.sum(jnp.exp(shifted), axis=1, keepdims=True))
        out_ref[pl.ds(row, bpad), :] = jnp.where(is_logit, shifted - lse, fused)
        return fused

    lax.fori_loop(0, seq_len, step, h0_ref[...], unroll=True)


def prepare_params(w_i2h, b_i2h, w_i2o, b_i2o, input_size):
    """One-time parameter packing (hoisted out of the per-call forward)."""
    hidden_size, C = w_i2h.shape
    output_size = w_i2o.shape[0]
    assert C == input_size + hidden_size
    n = hidden_size + output_size
    npad = ((n + 127) // 128) * 128                     # lane-dense width >= 128

    w_fused = jnp.zeros((C, npad), jnp.float32)
    w_fused = w_fused.at[:, :hidden_size].set(w_i2h.T.astype(jnp.float32))
    w_fused = w_fused.at[:, hidden_size:n].set(w_i2o.T.astype(jnp.float32))

    wx = w_fused[:input_size]                           # (I, NPAD)
    wh = w_fused[input_size:]                           # (H, NPAD)  (no pad rows)

    bias = jnp.zeros((1, npad), jnp.float32)
    bias = bias.at[0, :hidden_size].set(b_i2h.astype(jnp.float32))
    bias = bias.at[0, hidden_size:n].set(b_i2o.astype(jnp.float32))

    return dict(wx=wx, wh=wh, bias=bias,
                input_size=input_size, hidden_size=hidden_size,
                output_size=output_size, npad=npad)


def rnn_forward_seq(xs, h0, params):
    """Run T RNN steps with the time loop inside ONE pallas_call.

    xs: (T, B, input_size), h0: (B, hidden_size)
    Returns (log_softmax_outputs (T, B, O), final_hidden (B, H)).
    """
    T, B, I = xs.shape
    H = params["hidden_size"]
    O = params["output_size"]
    NPAD = params["npad"]
    BPAD = ((max(B, 8) + 7) // 8) * 8                   # full f32 sublanes

    xs_p = jnp.zeros((T, BPAD, I), jnp.float32).at[:, :B, :].set(
        xs.astype(jnp.float32))
    xs2d = xs_p.reshape(T * BPAD, I)
    h0_slab = jnp.zeros((BPAD, NPAD), jnp.float32).at[:B, :H].set(
        h0.astype(jnp.float32))

    kernel = functools.partial(rnn_fused_kernel, seq_len=T, bpad=BPAD,
                               hidden_size=H, output_size=O)

    out_slab = pl.pallas_call(
        kernel,
        out_shape=jax.ShapeDtypeStruct((T * BPAD, NPAD), jnp.float32),
        grid=(1,),
        in_specs=[
            pl.BlockSpec((T * BPAD, I), lambda i: (0, 0)),   # xs (resident)
            pl.BlockSpec((I, NPAD), lambda i: (0, 0)),       # Wx (resident)
            pl.BlockSpec((H, NPAD), lambda i: (0, 0)),       # Wh (resident, shrunk)
            pl.BlockSpec((1, NPAD), lambda i: (0, 0)),       # bias
            pl.BlockSpec((BPAD, NPAD), lambda i: (0, 0)),    # h0 slab
        ],
        out_specs=pl.BlockSpec((T * BPAD, NPAD), lambda i: (0, 0)),
        scratch_shapes=[pltpu.VMEM((T * BPAD, NPAD), jnp.float32)],
        compiler_params=pltpu.CompilerParams(
            dimension_semantics=("arbitrary",)),
    )(xs2d, params["wx"], params["wh"], params["bias"], h0_slab)

    out3 = out_slab.reshape(T, BPAD, NPAD)
    outputs = out3[:, :B, H:H + O]                      # (T, B, O) log-softmax
    final_hidden = out3[T - 1, :B, :H]                  # (B, H)
    return outputs, final_hidden


def rnn_forward(x, hidden, params):
    """Single RNN cell step — matches RNN.forward(input, hidden) of the module."""
    outs, h_new = rnn_forward_seq(x[None, ...], hidden, params)
    return outs[0], h_new


if __name__ == "__main__":
    batch = 2
    input_size = 16
    hidden_size = 32
    output_size = 8
    seq_len = 8
    C = input_size + hidden_size

    key = jax.random.PRNGKey(0)
    kx, kxs, kw1, kb1, kw2, kb2 = jax.random.split(key, 6)

    # Deterministic PyTorch nn.Linear-style uniform init.
    bound = 1.0 / (C ** 0.5)
    w_i2h = jax.random.uniform(kw1, (hidden_size, C), jnp.float32, -bound, bound)
    b_i2h = jax.random.uniform(kb1, (hidden_size,), jnp.float32, -bound, bound)
    w_i2o = jax.random.uniform(kw2, (output_size, C), jnp.float32, -bound, bound)
    b_i2o = jax.random.uniform(kb2, (output_size,), jnp.float32, -bound, bound)

    params = prepare_params(w_i2h, b_i2h, w_i2o, b_i2o, input_size)

    hp = jax.lax.Precision.HIGHEST

    # --- single step (the module's forward) ---
    x = jax.random.normal(kx, (batch, input_size), dtype=jnp.float32)
    h0 = jnp.zeros((batch, hidden_size), dtype=jnp.float32)   # init_hidden
    out, h1 = rnn_forward(x, h0, params)
    jax.block_until_ready((out, h1))

    comb = jnp.concatenate([x, h0], axis=1)
    ref_h = jnp.dot(comb, w_i2h.T, precision=hp) + b_i2h
    ref_o = jax.nn.log_softmax(jnp.dot(comb, w_i2o.T, precision=hp) + b_i2o,
                               axis=1)
    assert jnp.allclose(out, ref_o, atol=1e-4), "single-step output mismatch"
    assert jnp.allclose(h1, ref_h, atol=1e-4), "single-step hidden mismatch"

    # --- full sequence: T timesteps inside one pallas_call ---
    xs = jax.random.normal(kxs, (seq_len, batch, input_size), dtype=jnp.float32)
    outs, hT = rnn_forward_seq(xs, h0, params)
    jax.block_until_ready((outs, hT))

    h = h0
    for t in range(seq_len):
        comb_t = jnp.concatenate([xs[t], h], axis=1)
        o_t = jax.nn.log_softmax(
            jnp.dot(comb_t, w_i2o.T, precision=hp) + b_i2o, axis=1)
        h = jnp.dot(comb_t, w_i2h.T, precision=hp) + b_i2h
        assert jnp.allclose(outs[t], o_t, atol=1e-4), f"seq output mismatch t={t}"
    assert jnp.allclose(hT, h, atol=1e-4), "seq final hidden mismatch"

    print("KERNEL_OK")
</pallas_src>

<mosaic_0001>
module attributes {stable_mosaic.version = 11 : i64} {
  func.func @rnn_fused_kernel(%arg0: i32, %arg1: memref<8x16xf32, #tpu.memory_space<vmem>>, %arg2: memref<16x128xf32, #tpu.memory_space<vmem>>, %arg3: memref<32x128xf32, #tpu.memory_space<vmem>>, %arg4: memref<1x128xf32, #tpu.memory_space<vmem>>, %arg5: memref<8x128xf32, #tpu.memory_space<vmem>>, %arg6: memref<8x128xf32, #tpu.memory_space<vmem>>, %arg7: memref<8x128xf32, #tpu.memory_space<vmem>>) attributes {dimension_semantics = [#tpu.dimension_semantics<arbitrary>], iteration_bounds = array<i64: 1>, scalar_prefetch = 0 : i64, scratch_operands = 1 : i64, tpu.core_type = #tpu.core_type<tc>, window_params = [{pipeline_mode = #tpu.pipeline_mode<synchronous>, transform_indices = @transform_0, window_bounds = array<i64: 8, 16>}, {pipeline_mode = #tpu.pipeline_mode<synchronous>, transform_indices = @transform_1, window_bounds = array<i64: 16, 128>}, {pipeline_mode = #tpu.pipeline_mode<synchronous>, transform_indices = @transform_2, window_bounds = array<i64: 32, 128>}, {pipeline_mode = #tpu.pipeline_mode<synchronous>, transform_indices = @transform_3, window_bounds = array<i64: 1, 128>}, {pipeline_mode = #tpu.pipeline_mode<synchronous>, transform_indices = @transform_4, window_bounds = array<i64: 8, 128>}, {pipeline_mode = #tpu.pipeline_mode<synchronous>, transform_indices = @transform_5, window_bounds = array<i64: 8, 128>}]} {
    %c0 = arith.constant 0 : index
    %c0_0 = arith.constant 0 : index
    %0 = vector.load %arg1[%c0, %c0_0] : memref<8x16xf32, #tpu.memory_space<vmem>>, vector<8x16xf32>
    %c0_1 = arith.constant 0 : index
    %c0_2 = arith.constant 0 : index
    %1 = vector.load %arg2[%c0_1, %c0_2] : memref<16x128xf32, #tpu.memory_space<vmem>>, vector<16x128xf32>
    %cst = arith.constant dense<0.000000e+00> : vector<8x128xf32>
    %2 = tpu.matmul %0, %1, %cst {dimension_numbers = #tpu.dot_dimension_numbers<[1], [0], [0], [1], [0, 0, 1, 1], [], []>, precision = #tpu.contract_precision<fp32>} : vector<8x16xf32>, vector<16x128xf32>, vector<8x128xf32> -> vector<8x128xf32>
    %c0_3 = arith.constant 0 : index
    %c0_4 = arith.constant 0 : index
    %3 = vector.load %arg4[%c0_3, %c0_4] : memref<1x128xf32, #tpu.memory_space<vmem>>, vector<1x128xf32>
    %4 = vector.broadcast %3 : vector<1x128xf32> to vector<8x128xf32>
    %5 = arith.addf %2, %4 : vector<8x128xf32>
    %c0_5 = arith.constant 0 : index
    %c0_6 = arith.constant 0 : index
    %6 = vector.load %arg7[%c0_5, %c0_6] : memref<8x128xf32, #tpu.memory_space<vmem>>, vector<8x128xf32>
    tpu.vector_store %arg7[%c0_5, %c0_6], %5 {strides = array<i32>} : memref<8x128xf32, #tpu.memory_space<vmem>>, vector<8x128xf32>,
    %7 = tpu.iota {dimensions = array<i32: 1>} : vector<8x128xi32>
    %c32_i32 = arith.constant 32 : i32
    %8 = vector.broadcast %c32_i32 : i32 to vector<8x128xi32>
    %9 = arith.cmpi sge, %7, %8 : vector<8x128xi32>
    %c40_i32 = arith.constant 40 : i32
    %10 = vector.broadcast %c40_i32 : i32 to vector<8x128xi32>
    %11 = arith.cmpi slt, %7, %10 : vector<8x128xi32>
    %12 = arith.andi %9, %11 : vector<8x128xi1>
    %cst_7 = arith.constant -1.000000e+30 : f32
    %13 = vector.broadcast %cst_7 : f32 to vector<8x128xf32>
    %c0_8 = arith.constant 0 : index
    %c0_9 = arith.constant 0 : index
    %14 = vector.load %arg3[%c0_8, %c0_9] : memref<32x128xf32, #tpu.memory_space<vmem>>, vector<32x128xf32>
    %c0_10 = arith.constant 0 : index
    %c0_11 = arith.constant 0 : index
    %15 = vector.load %arg5[%c0_10, %c0_11] : memref<8x128xf32, #tpu.memory_space<vmem>>, vector<8x128xf32>
    %c0_i32 = arith.constant 0 : i32
    %c8_i32 = arith.constant 8 : i32
    %16 = arith.muli %c0_i32, %c8_i32 : i32
    %17 = tpu.assume_multiple %16, 8 : i32
    %18 = arith.index_cast %17 : i32 to index
    %c0_12 = arith.constant 0 : index
    %19 = vector.load %arg7[%18, %c0_12] : memref<8x128xf32, #tpu.memory_space<vmem>>, vector<8x128xf32>
    %20 = vector.extract_strided_slice %15 {offsets = [0, 0], sizes = [8, 32], strides = [1, 1]} : vector<8x128xf32> to vector<8x32xf32>
    %cst_13 = arith.constant dense<0.000000e+00> : vector<8x128xf32>
    %21 = tpu.matmul %20, %14, %cst_13 {dimension_numbers = #tpu.dot_dimension_numbers<[1], [0], [0], [1], [0, 0, 1, 1], [], []>, precision = #tpu.contract_precision<fp32>} : vector<8x32xf32>, vector<32x128xf32>, vector<8x128xf32> -> vector<8x128xf32>
    %22 = arith.addf %19, %21 : vector<8x128xf32>
    %23 = arith.select %12, %22, %13 : vector<8x128xi1>, vector<8x128xf32>
    %cst_14 = arith.constant dense<0xFF800000> : vector<8xf32>
    %24 = vector.multi_reduction <maximumf>, %23, %cst_14 [1] : vector<8x128xf32> to vector<8xf32>
    %25 = vector.shape_cast %24 : vector<8xf32> to vector<8x1xf32>
    %26 = vector.broadcast %25 : vector<8x1xf32> to vector<8x128xf32>
    %27 = arith.subf %23, %26 : vector<8x128xf32>
    %28 = math.exp %27 : vector<8x128xf32>
    %cst_15 = arith.constant dense<0.000000e+00> : vector<8xf32>
    %29 = vector.multi_reduction <add>, %28, %cst_15 [1] : vector<8x128xf32> to vector<8xf32>
    %30 = vector.shape_cast %29 : vector<8xf32> to vector<8x1xf32>
    %31 = math.log %30 : vector<8x1xf32>
    %32 = vector.broadcast %31 : vector<8x1xf32> to vector<8x128xf32>
    %33 = arith.subf %27, %32 : vector<8x128xf32>
    %34 = arith.select %12, %33, %22 : vector<8x128xi1>, vector<8x128xf32>
    %35 = arith.index_cast %17 : i32 to index
    %c0_16 = arith.constant 0 : index
    %36 = vector.load %arg6[%35, %c0_16] : memref<8x128xf32, #tpu.memory_space<vmem>>, vector<8x128xf32>
    tpu.vector_store %arg6[%35, %c0_16], %34 {strides = array<i32>} : memref<8x128xf32, #tpu.memory_space<vmem>>, vector<8x128xf32>,
    %c1_i32 = arith.constant 1 : i32
    return
  }
  func.func @transform_0(%arg0: i32) -> (i32, i32) {
    %c0_i32 = arith.constant 0 : i32
    %c0_i32_0 = arith.constant 0 : i32
    %c0_i32_1 = arith.constant 0 : i32
    return %c0_i32, %c0_i32_0 : i32, i32
  }
  func.func @transform_1(%arg0: i32) -> (i32, i32) {
    %c0_i32 = arith.constant 0 : i32
    %c0_i32_0 = arith.constant 0 : i32
    %c0_i32_1 = arith.constant 0 : i32
    return %c0_i32, %c0_i32_0 : i32, i32
  }
  func.func @transform_2(%arg0: i32) -> (i32, i32) {
    %c0_i32 = arith.constant 0 : i32
    %c0_i32_0 = arith.constant 0 : i32
    %c0_i32_1 = arith.constant 0 : i32
    return %c0_i32, %c0_i32_0 : i32, i32
  }
  func.func @transform_3(%arg0: i32) -> (i32, i32) {
    %c0_i32 = arith.constant 0 : i32
    %c0_i32_0 = arith.constant 0 : i32
    %c0_i32_1 = arith.constant 0 : i32
    return %c0_i32, %c0_i32_0 : i32, i32
  }
  func.func @transform_4(%arg0: i32) -> (i32, i32) {
    %c0_i32 = arith.constant 0 : i32
    %c0_i32_0 = arith.constant 0 : i32
    %c0_i32_1 = arith.constant 0 : i32
    return %c0_i32, %c0_i32_0 : i32, i32
  }
  func.func @transform_5(%arg0: i32) -> (i32, i32) {
    %c0_i32 = arith.constant 0 : i32
    %c0_i32_0 = arith.constant 0 : i32
    %c0_i32_1 = arith.constant 0 : i32
    return %c0_i32, %c0_i32_0 : i32, i32
  }
}

</mosaic_0001>

<bundles_post_ra>
// kernel: tpu_custom_call.1
= control target key start
LH: loop header
LB: loop body
LE: loop exit
PB: predicated region body
PF: predicated region fallthrough
CT: control target
= control target key end

     0   :  { %10 = vsyncpa [#allocation4], 0  ;;  %s1630_s0 = inlined_call_operand.hbm [shape: f32[8,16], index: 0, kind: input, shape index: {}]   ;;  %s1631_s1 = inlined_call_operand.hbm [shape: f32[16,128], index: 1, kind: input, shape index: {}]   ;;  %s1632_s2 = inlined_call_operand.hbm [shape: f32[32,128], index: 2, kind: input, shape index: {}]   ;;  %s1633_s3 = inlined_call_operand.vmem [shape: f32[1,128], index: 3, kind: input, shape index: {}]   ;;  %s1634_s4 = inlined_call_operand.vmem [shape: f32[8,128], index: 4, kind: input, shape index: {}]   ;;  %s1635_s5 = inlined_call_operand.hbm [shape: f32[8,128], index: 5, kind: output, shape index: {}]  }
   0x1   :  { %11 = vsyncpa [#allocation7], 0 }
   0x2   :  { %12 = vsyncpa [#allocation5], 0  ;;  %s1402_s18 = smov [#allocation6]   ;;  %s1308_s22 = scalar_lea.hbm %s1631_s1, 256 }
   0x3   :  { %s28_s19 = sshll.u32 %s1402_s18, 4  ;;  %p1309_p0 = scmp.ne.s32.totalorder %s1631_s1, %s1308_s22  ;;  %s29_s19 = int_to_ptr.vmem [resolvable:$true] %s28_s19 }
   0x4   :  { %p1312_p1 = scmp.lt.u32.totalorder %s1308_s22, %s1631_s1 }
   0x6   :  { %p1314_p2 = pnand %p1312_p1, %p1309_p0 }
   0x8   :  { %1317 = shalt.err (!%p1314_p2)
}
   0x9   :  { %s1318_s27 = scalar_lea.vmem %s29_s19, 256  ;;  %p1323_p4 = scmp.lt.s32.totalorder %s29_s19, %s29_s19 }
   0xa   :  { %p1319_p3 = scmp.ne.s32.totalorder %s29_s19, %s1318_s27  ;;  %p1324_p5 = scmp.lt.s32.totalorder %s1318_s27, %s1318_s27 }
   0xc   :  { %p1325_p6 = por %p1324_p5, %p1323_p4 }
   0xe   :  { %p1326_p7 = pnand %p1325_p6, %p1319_p3 }
  0x10   :  { %1329 = shalt.err (!%p1326_p7)
}
  0x11   :  { %s1403_s28 = smov 128   ;;  %s1404_s29 = smov 8  }
  0x12   :  { %34 = dma.hbm_to_vmem [thread:$0]  %s1631_s1, 256, %s29_s19, [#allocation7], %s1403_s28, %s1403_s28, %s1404_s29  }
  0x13   :  { %s1405_s7 = smov [#allocation3]   ;;  %s1406_s9 = smov [#allocation8]  }
  0x14   :  { %s19_s8 = sshll.u32 %s1405_s7, 4  ;;  %s40_s10 = sshll.u32 %s1406_s9, 4  ;;  %s20_s8 = int_to_ptr.vmem [resolvable:$true] %s19_s8  ;;  %s41_s10 = int_to_ptr.vmem [resolvable:$true] %s40_s10 }
  0x15   :  { %s1330_s13 = scalar_lea.hbm %s1630_s0, 128 }
  0x16   :  { %p1331_p8 = scmp.ne.s32.totalorder %s1630_s0, %s1330_s13  ;;  %p1334_p9 = scmp.lt.u32.totalorder %s1330_s13, %s1630_s0 }
  0x18   :  { %p1336_p10 = pnand %p1334_p9, %p1331_p8 }
  0x1a   :  { %1339 = shalt.err (!%p1336_p10)
}
  0x1b   :  { %s1340_s1 = scalar_lea.vmem %s20_s8, 128  ;;  %p1345_p12 = scmp.lt.s32.totalorder %s20_s8, %s20_s8 }
  0x1c   :  { %p1341_p11 = scmp.ne.s32.totalorder %s20_s8, %s1340_s1  ;;  %p1346_p13 = scmp.lt.s32.totalorder %s1340_s1, %s1340_s1 }
  0x1e   :  { %p1347_p0 = por %p1346_p13, %p1345_p12 }
  0x20   :  { %p1348_p1 = pnand %p1347_p0, %p1341_p11 }
  0x22   :  { %1351 = shalt.err (!%p1348_p1)
}
  0x23   :  { %22 = dma.hbm_to_vmem [thread:$0]  %s1630_s0, 128, %s20_s8, [#allocation4]  }
  0x24   :  { %s1352_s22 = scalar_lea.hbm %s1632_s2, 512 }
  0x25   :  { %p1353_p2 = scmp.ne.s32.totalorder %s1632_s2, %s1352_s22  ;;  %p1356_p3 = scmp.lt.u32.totalorder %s1352_s22, %s1632_s2 }
  0x27   :  { %p1358_p4 = pnand %p1356_p3, %p1353_p2 }
  0x29   :  { %1361 = shalt.err (!%p1358_p4)
}
  0x2a   :  { %s1362_s27 = scalar_lea.vmem %s41_s10, 512  ;;  %p1367_p6 = scmp.lt.s32.totalorder %s41_s10, %s41_s10 }
  0x2b   :  { %p1363_p5 = scmp.ne.s32.totalorder %s41_s10, %s1362_s27  ;;  %p1368_p7 = scmp.lt.s32.totalorder %s1362_s27, %s1362_s27 }
  0x2d   :  { %p1369_p8 = por %p1368_p7, %p1367_p6 }
  0x2f   :  { %p1370_p9 = pnand %p1369_p8, %p1363_p5 }
  0x31   :  { %1373 = shalt.err (!%p1370_p9)
}
  0x32   :  { %46 = dma.hbm_to_vmem [thread:$0]  %s1632_s2, 512, %s41_s10, [#allocation7], %s1403_s28, %s1403_s28, %s1404_s29  }
  0x33   :  { %1396 = dma.done.wait [#allocation4], 128  }
  0x34   :  { %1397 = vsyncadd [#allocation4], 4294967168 }
  0x35   :  { %1398 = dma.done.wait [#allocation7], 768  }
  0x36   :  { %1399 = vsyncadd [#allocation7], 4294966528  ;;  %v1407_v0 = vmov 0.0|0.0   ;;  %vm1408_vm0 = vmmov 0   ;;  %v1409_v1 = vmov 0.0   ;;  %vm70_vm1 = vcmask 130048  }
  0x37   :  { %1221 = vmatprep.subr.bf16.mxu1 %v1407_v0  ;;  %1117 = vmatprep.mubr.msk.f32.mxu1 %vm1408_vm0, %v1409_v1  ;;  %v61_v2 = vld [vmem:[#allocation6] sm:$0xff]  ;;  %v62_v3 = vld [vmem:[#allocation6 + $0x8] sm:$0xff]  ;;  %v60_v4 = vld [vmem:[#allocation3] sm:$0xff]  ;;  %vm545_vm2 = vcmask 261120  }
  0x38   :  { %1224 = vmatprep.subr.bf16.mxu0 %v1407_v0  ;;  %1124 = vmatprep.mubr.msk.f32.mxu0 %vm1408_vm0, %v1409_v1  ;;  %v75_v5 = vand.u32 4294901760, %v61_v2  ;;  %v78_v6 = vand.u32 4294901760, %v62_v3  ;;  %v72_v7 = vsel %vm70_vm1, %v60_v4, 0  ;;  %v539_v8 = vld [vmem:[#allocation8] sm:$0xff]  ;;  %v540_v9 = vld [vmem:[#allocation8 + $0x8] sm:$0xff]  ;;  %v541_v10 = vld [vmem:[#allocation8 + $0x10] sm:$0xff] }
  0x39   :  { %v1489_v11 = vand.u32 4294901760, %v72_v7  ;;  %v550_v12 = vand.u32 4294901760, %v539_v8  ;;  %v553_v13 = vand.u32 4294901760, %v540_v9  ;;  %v542_v14 = vld [vmem:[#allocation8 + $0x18] sm:$0xff]  ;;  %v556_v15 = vand.u32 4294901760, %v541_v10  ;;  %v543_v20 = vld [vmem:[%s1634_s4] sm:$0xff] }
  0x3a   :  { %v1491_v16 = vpack.c.bf16 %v78_v6, %v75_v5  ;;  %v1493_v17 = vsub.f32 %v61_v2, %v75_v5  ;;  %v1495_v18 = vsub.f32 %v62_v3, %v78_v6  ;;  %v559_v19 = vand.u32 4294901760, %v542_v14  ;;  %v1064_v4 = vld [vmem:[%s1633_s3] ss:$0 sm:$0xff]  ;;  %s1410_s3 = smov [#allocation9]  }
  0x3b   :  { %v1501_v21 = vsub.f32 %v72_v7, %v1489_v11  ;;  %v1503_v22 = vsub.f32 %v539_v8, %v550_v12  ;;  %v1505_v23 = vsub.f32 %v540_v9, %v553_v13  ;;  %v1510_v26 = vsub.f32 %v541_v10, %v556_v15  ;;  %s1054_s6 = sshll.u32 %s1410_s3, 4  ;;  %s1055_s6 = int_to_ptr.vmem [resolvable:$true] %s1054_s6 }
  0x3c   :  { %1223 = vmatpush3.bf16.msra.mxu1 %v1491_v16  ;;  %v154_v24 = vand.u32 4294901760, %v1493_v17  ;;  %v161_v25 = vand.u32 4294901760, %v1495_v18  ;;  %v1514_v28 = vpack.c.bf16 %v553_v13, %v550_v12  ;;  %v1516_v29 = vsub.f32 %v542_v14, %v559_v19  ;;  %s1374_s7 = scalar_lea.vmem %s1055_s6, 128  ;;  %p1379_p11 = scmp.lt.s32.totalorder %s1055_s6, %s1055_s6 }
  0x3d   :  { %1239 = vmatprep.subr.bf16.mxu1 %v1407_v0  ;;  %v143_v27 = vand.u32 4294901760, %v1501_v21  ;;  %v547_v30 = vsel %vm545_vm2, %v543_v20, 0  ;;  %v631_v34 = vand.u32 4294901760, %v1503_v22  ;;  %v638_v36 = vand.u32 4294901760, %v1505_v23  ;;  %p1375_p10 = scmp.ne.s32.totalorder %s1055_s6, %s1374_s7  ;;  %p1380_p12 = scmp.lt.s32.totalorder %s1374_s7, %s1374_s7 }
  0x3e   :  { %v155_v31 = vsub.f32 %v1493_v17, %v154_v24  ;;  %v162_v32 = vsub.f32 %v1495_v18, %v161_v25  ;;  %v1521_v33 = vand.u32 4294901760, %v547_v30  ;;  %v645_v37 = vand.u32 4294901760, %v1510_v26 }
  0x3f   :  { %v144_v35 = vsub.f32 %v1501_v21, %v143_v27  ;;  %v652_v38 = vand.u32 4294901760, %v1516_v29  ;;  %v632_v42 = vsub.f32 %v1503_v22, %v631_v34  ;;  %v639_v44 = vsub.f32 %v1505_v23, %v638_v36  ;;  %p1381_p13 = por %p1380_p12, %p1379_p11 }
  0x40   :  { %v156_v39 = vand.u32 4294901760, %v155_v31  ;;  %v163_v40 = vand.u32 4294901760, %v162_v32  ;;  %v619_v41 = vsub.f32 %v547_v30, %v1521_v33  ;;  %v1535_v47 = vpack.c.bf16 %v559_v19, %v556_v15 }
  0x41   :  { %v145_v43 = vand.u32 4294901760, %v144_v35  ;;  %v1228_v48 = vpack.c.bf16 %v1495_v18, %v1493_v17  ;;  %v646_v49 = vsub.f32 %v1510_v26, %v645_v37  ;;  %v633_v51 = vand.u32 4294901760, %v632_v42  ;;  %p1382_p0 = pnand %p1381_p13, %p1375_p10 }
  0x42   :  { %v1225_v45 = vpack.c.bf16 %v163_v40, %v156_v39  ;;  %v620_v46 = vand.u32 4294901760, %v619_v41  ;;  %v640_v52 = vand.u32 4294901760, %v639_v44  ;;  %v653_v53 = vsub.f32 %v1516_v29, %v652_v38 }
  0x43   :  { %1118 = vmatmul.mubr.f32.vlgmr.msra.gmra.mrb[0].mxu1 %v145_v43  ;;  %v647_v56 = vand.u32 4294901760, %v646_v49  ;;  %v1252_v59 = vpack.c.bf16 %v1505_v23, %v1503_v22  ;;  %v1255_v60 = vpack.c.bf16 %v1516_v29, %v1510_v26  ;;  %v1234_v61 = vpack.c.bf16 %v161_v25, %v154_v24 }
  0x44   :  { %1241 = vmatpush3.bf16.msra.mxu1 %v1514_v28  ;;  %1226 = vmatpush3.bf16.msra.mxu0 %v1225_v45  ;;  %v621_v50 = vsub.f32 %v619_v41, %v620_v46  ;;  %v1246_v55 = vpack.c.bf16 %v640_v52, %v633_v51  ;;  %v654_v57 = vand.u32 4294901760, %v653_v53  ;;  %v1264_v62 = vpack.c.bf16 %v638_v36, %v631_v34 }
  0x45   :  { %1242 = vmatprep.subr.bf16.mxu1 %v1407_v0  ;;  %1227 = vmatprep.subr.bf16.mxu0 %v1407_v0  ;;  %v1267_v63 = vpack.c.bf16 %v652_v38, %v645_v37 }
  0x46   :  { %1163 = vmatprep.mubr.msk.f32.mxu1 %vm1408_vm0, %v1409_v1  ;;  %v622_v54 = vand.u32 4294901760, %v621_v50  ;;  %v1249_v58 = vpack.c.bf16 %v654_v57, %v647_v56 }
  0x47   :  { %1125 = vmatmul.mubr.f32.vlgmr.msra.gmra.mrb[0].mxu0 %v1489_v11 }
  0x48   :  { %1244 = vmatpush3.bf16.msra.mxu1 %v1535_v47  ;;  %1229 = vmatpush3.bf16.msra.mxu0 %v1228_v48 }
  0x49   :  { %1245 = vmatprep.subr.bf16.mxu1 %v1407_v0  ;;  %1131 = vmatprep.mubr.msk.f32.mxu0 %vm1408_vm0, %v1409_v1 }
  0x4a   :  { %1230 = vmatprep.subr.bf16.mxu0 %v1407_v0 }
  0x4b   :  { %1164 = vmatmul.mubr.f32.vlgmr.msra.gmra.mrb[2].mxu1 %v622_v54 }
  0x4c   :  { %1247 = vmatpush3.bf16.msra.mxu1 %v1246_v55  ;;  %1174 = vmatprep.mubr.msk.f32.mxu1 %vm1408_vm0, %v1409_v1 }
  0x4d   :  { %1248 = vmatprep.subr.bf16.mxu1 %v1407_v0 }
  0x4f   :  { %1132 = vmatmul.mubr.f32.vlgmr.msra.gmra.mrb[0].mxu0 %v1501_v21 }
  0x50   :  { %1250 = vmatpush3.bf16.msra.mxu1 %v1249_v58  ;;  %1232 = vmatpush3.bf16.msra.mxu0 %v1491_v16 }
  0x51   :  { %1251 = vmatprep.subr.bf16.mxu1 %v1407_v0  ;;  %1138 = vmatprep.mubr.msk.f32.mxu0 %vm1408_vm0, %v1409_v1 }
  0x52   :  { %1233 = vmatprep.subr.bf16.mxu0 %v1407_v0 }
  0x53   :  { %1175 = vmatmul.mubr.f32.vlgmr.msra.gmra.mrb[2].mxu1 %v1521_v33 }
  0x54   :  { %1253 = vmatpush3.bf16.msra.mxu1 %v1252_v59  ;;  %1185 = vmatprep.mubr.msk.f32.mxu1 %vm1408_vm0, %v1409_v1 }
  0x55   :  { %1254 = vmatprep.subr.bf16.mxu1 %v1407_v0 }
  0x57   :  { %1139 = vmatmul.mubr.f32.vlgmr.msra.gmra.mrb[0].mxu0 %v143_v27 }
  0x58   :  { %1256 = vmatpush3.bf16.msra.mxu1 %v1255_v60  ;;  %1235 = vmatpush3.bf16.msra.mxu0 %v1234_v61 }
  0x59   :  { %1257 = vmatprep.subr.bf16.mxu1 %v1407_v0  ;;  %1145 = vmatprep.mubr.msk.f32.mxu0 %vm1408_vm0, %v1409_v1 }
  0x5a   :  { %1236 = vmatprep.subr.bf16.mxu0 %v1407_v0 }
  0x5b   :  { %1186 = vmatmul.mubr.f32.vlgmr.msra.gmra.mrb[2].mxu1 %v619_v41 }
  0x5c   :  { %1259 = vmatpush3.bf16.msra.mxu1 %v1514_v28  ;;  %1196 = vmatprep.mubr.msk.f32.mxu1 %vm1408_vm0, %v1409_v1 }
  0x5d   :  { %1260 = vmatprep.subr.bf16.mxu1 %v1407_v0 }
  0x5f   :  { %1146 = vmatmul.mubr.f32.vlgmr.msra.gmra.mrb[0].mxu0 %v1489_v11 }
  0x60   :  { %1262 = vmatpush3.bf16.msra.mxu1 %v1535_v47  ;;  %1238 = vmatpush3.bf16.msra.mxu0 %v1491_v16 }
  0x61   :  { %1152 = vmatprep.mubr.msk.f32.mxu0 %vm1408_vm0, %v1409_v1  ;;  %1263 = vmatprep.subr.bf16.mxu0 %v1407_v0 }
  0x63   :  { %1197 = vmatmul.mubr.f32.vlgmr.msra.gmra.mrb[2].mxu1 %v620_v46 }
  0x67   :  { %1153 = vmatmul.mubr.f32.vlgmr.msra.gmra.mrb[0].mxu0 %v1489_v11 }
  0x68   :  { %1265 = vmatpush3.bf16.msra.mxu0 %v1264_v62  ;;  %1207 = vmatprep.mubr.msk.f32.mxu0 %vm1408_vm0, %v1409_v1 }
  0x69   :  { %1266 = vmatprep.subr.bf16.mxu0 %v1407_v0 }
  0x6c   :  { %1268 = vmatpush3.bf16.msra.mxu0 %v1267_v63 }
  0x6d   :  { %1269 = vmatprep.subr.bf16.mxu0 %v1407_v0 }
  0x6f   :  { %1208 = vmatmul.mubr.f32.vlgmr.msra.gmra.mrb[2].mxu0 %v1521_v33 }
  0x70   :  { %1271 = vmatpush3.bf16.msra.mxu0 %v1514_v28  ;;  %1218 = vmatprep.mubr.msk.f32.mxu0 %vm1408_vm0, %v1409_v1  ;;  %v534_v1 = vlaneseq }
  0x71   :  { %1272 = vmatprep.subr.bf16.mxu0 %v1407_v0 }
  0x72   :  { %v535_v12 = vand.u32 127, %v534_v1 }
  0x74   :  { %1274 = vmatpush3.bf16.msra.mxu0 %v1535_v47  ;;  %vm536_vm3 = vcmp.ge.s32.totalorder %v535_v12, 32  ;;  %vm537_vm4 = vcmp.lt.s32.totalorder %v535_v12, 40 }
  0x75   :  { %vm1610_vm5 = vmand %vm536_vm3, %vm537_vm4 }
  0x77   :  { %1219 = vmatmul.mubr.f32.vlgmr.msra.gmra.mrb[2].mxu0 %v1521_v33 }
 0x116   :  { %v147_v2 = vpop.f32.mrb[0].mxu1 }
 0x117   :  { %v1119_v3 = vpop.f32.mrb[1].mxu1  ;;  %v148_v7 = vadd.f32 %v1064_v4, %v147_v2 }
 0x136   :  { %v872_v5 = vpop.f32.mrb[2].mxu1 }
 0x137   :  { %v1198_v6 = vpop.f32.mrb[3].mxu1 }
 0x13a   :  { %v529_v8 = vpop.f32.mrb[0].mxu0 }
 0x13b   :  { %v1276_v9 = vadd.f32 %v529_v8, %v148_v7  ;;  %v1154_v10 = vpop.f32.mrb[1].mxu0 }
 0x13d   :  { %v1277_v11 = vadd.f32 %v1276_v9, %v872_v5 }
 0x14a   :  { %v1030_v0 = vpop.f32.mrb[2].mxu0 }
 0x14b   :  { %v1278_v14 = vadd.f32 %v1277_v11, %v1030_v0  ;;  %v1220_v15 = vpop.f32.mrb[3].mxu0 }
 0x14d   :  { %v1035_v16 = vsel %vm1610_vm5, %v1278_v14, -1e+30 }
 0x14e   :  { %1036 = vmax.xlane.f32.xlu0 %v1035_v16 }
 0x1db   :  { %v1037_v17 = vpop.xlane.xlu0 %1036 }
 0x1dc   :  { %v1038_v18 = vsub.f32 %v1035_v16, %v1037_v17 }
 0x1de   :  { %v1039_v19 = vmul.f32 1.442695, %v1038_v18 }
 0x1e0   :  { %1304 = vpow2.f32 %v1039_v19 }
 0x1ea   :  { %v1305_v20 = vpop.eup %1304 }
 0x1eb   :  { %1041 = vadd.xlane.f32.xlu0 %v1305_v20 }
 0x278   :  { %v1042_v21 = vpop.xlane.xlu0 %1041 }
 0x279   :  { %1306 = vlog2.f32 %v1042_v21 }
 0x283   :  { %v1307_v22 = vpop.eup %1306 }
 0x284   :  { %v1044_v23 = vmul.f32 0.6931472, %v1307_v22 }
 0x286   :  { %v1045_v24 = vsub.f32 %v1038_v18, %v1044_v23 }
 0x288   :  { %v1046_v25 = vsel %vm1610_vm5, %v1045_v24, %v1278_v14 }
 0x289   :  { %1047 = vst [vmem:[#allocation9] sm:$0xff] %v1046_v25 }
 0x28a   :  { %1385 = shalt.err (!%p1382_p0)
}
 0x28b   :  { %s1386_s10 = scalar_lea.hbm %s1635_s5, 128 }
 0x28c   :  { %p1387_p1 = scmp.ne.s32.totalorder %s1635_s5, %s1386_s10  ;;  %p1390_p2 = scmp.lt.u32.totalorder %s1386_s10, %s1635_s5 }
 0x28e   :  { %p1392_p3 = pnand %p1390_p2, %p1387_p1 }
 0x290   :  { %1395 = shalt.err (!%p1392_p3)
}
 0x291   :  { %1057 = dma.vmem_to_hbm [thread:$0]  %s1055_s6, 128, %s1635_s5, [#allocation5]  }
 0x292   :  { %1400 = dma.done.wait [#allocation5], 128  }
 0x293   :  { %1401 = vsyncadd [#allocation5], 4294967168 }
 0x294   :  { %1061 = vsyncpa [#allocation4], 1 }
 0x295   :  { %1062 = vsyncpa [#allocation7], 1 }
 0x296   :  { %1063 = vsyncpa [#allocation5], 1 }

</bundles_post_ra>
